<compile_context>
chip_gen: v7x
topology: tpu7x:2x2x1
jax: 0.10.0
libtpu: 0.0.40
codegen_flags: <defaults>
</compile_context>

<pallas_src>
import jax
import jax.numpy as jnp
from jax.experimental import pallas as pl
from jax.experimental.pallas import tpu as pltpu


def _round_up(n: int, m: int) -> int:
    return ((n + m - 1) // m) * m


def _cdiv(a: int, b: int) -> int:
    return (a + b - 1) // b


def _largest_divisor_tile(total: int, base: int, cap: int) -> int:
    """Largest multiple of `base` that divides `total` (a multiple of `base`)
    and is <= cap.  Falls back to `base`."""
    chunks = total // base
    max_k = max(1, min(chunks, cap // base))
    for k in range(max_k, 0, -1):
        if chunks % k == 0:
            return k * base
    return base


def _vmem_bytes(tm: int, tf: int, D: int) -> int:
    """Estimate of the double-buffered VMEM working set for one grid step."""
    in_blocks = (tm * D * 2          # x tile (bf16)
                 + D * tf * 2        # W1 slice (bf16)
                 + tf * D * 2        # W2 slice (bf16)
                 + max(tf, 128) * 4  # b1 slice (f32)
                 + max(D, 128) * 4)  # b2 (f32)
    out_block = tm * D * 4           # resident f32 output block
    temps = tm * tf * 4 + tm * D * 4  # hidden f32 temp + partial-dot result
    return 2 * (in_blocks + out_block) + temps


def _ffn_kernel(x_ref, w1_ref, b1_ref, w2_ref, b2_ref, o_ref):
    """One (row_tile, ff_tile) step of: relu(x @ W1 + b1) @ W2 + b2."""
    j = pl.program_id(1)

    @pl.when(j == 0)
    def _():
        o_ref[...] = jnp.zeros_like(o_ref)

    # First linear + bias + ReLU for this d_ff slice (bf16 operands -> f32 acc).
    h = jnp.dot(x_ref[...], w1_ref[...], preferred_element_type=jnp.float32)
    h = jnp.maximum(h + b1_ref[...], 0.0)
    # TODO(synk): nn.Dropout is implemented in eval/inference mode (identity);
    # training-mode random masking is not applied here.

    # Second linear: accumulate the partial product directly into the resident
    # f32 output block (output block index is j-invariant).
    o_ref[...] += jnp.dot(
        h.astype(w2_ref.dtype), w2_ref[...], preferred_element_type=jnp.float32
    )

    @pl.when(j == pl.num_programs(1) - 1)
    def _():
        o_ref[...] += b2_ref[...]


def feed_forward(x, w1, b1, w2, b2, *, row_tile=512, ff_tile=512):
    """FeedForward.forward.

    Args:
      x:  (batch, context, d_model)
      w1: (d_model, d_ff)  b1: (d_ff,)     -- linear1
      w2: (d_ff, d_model)  b2: (d_model,)  -- linear2
    Returns:
      (batch, context, d_model), same dtype as x.
    """
    B, S, D = x.shape
    Dff = w1.shape[1]
    rows = B * S
    orig_dtype = x.dtype

    # ---- VMEM budget (generation-aware where possible). -------------------
    try:
        vmem_cap = int(pltpu.get_tpu_info().vmem_capacity_bytes)
        budget = int(0.55 * vmem_cap)          # leave headroom for the compiler
    except Exception:
        budget = 40 << 20                       # safe on v5e/v6e (128 MiB) & v7x (64 MiB)

    # ---- Tile selection ----------------------------------------------------
    # d_ff: pad only to the next multiple of 128 and pick a tile that divides
    # it exactly (no waste from padding up to a fixed 512).
    dff_p = _round_up(Dff, 128)
    # Row axis: >= 2 tiles whenever possible so both v7x TensorCores get work.
    min_row_tiles = 2 if rows >= 16 else 1

    ff_cap, row_cap = ff_tile, row_tile
    tf = tm = n_rows = None
    for _ in range(16):
        tf = _largest_divisor_tile(dff_p, 128, max(ff_cap, 128))
        n_rows = max(_cdiv(rows, max(row_cap, 8)), min_row_tiles)
        tm = _round_up(_cdiv(rows, n_rows), 8)
        if _vmem_bytes(tm, tf, D) <= budget:
            break
        if tf > 128 and (tf >= tm or tm <= 64):
            ff_cap = max(128, tf // 2)
        elif tm > 8:
            row_cap = max(8, tm // 2)
        else:
            break
    rows_p = tm * n_rows

    # ---- Padding (zero-padded W1 cols / b1 give relu(0)=0 hidden units, so
    # padded d_ff contributes nothing; padded rows are sliced off). ----------
    x2 = x.reshape(rows, D)
    if rows_p != rows:
        x2 = jnp.pad(x2, ((0, rows_p - rows), (0, 0)))
    if dff_p != Dff:
        w1 = jnp.pad(w1, ((0, 0), (0, dff_p - Dff)))
        b1 = jnp.pad(b1, (0, dff_p - Dff))
        w2 = jnp.pad(w2, ((0, dff_p - Dff), (0, 0)))

    # bf16 operands feed the MXU at native rate; accumulation stays f32.
    x2 = x2.astype(jnp.bfloat16)
    w1 = w1.astype(jnp.bfloat16)
    w2 = w2.astype(jnp.bfloat16)
    b1_2 = b1.astype(jnp.float32).reshape(1, dff_p)
    b2_2 = b2.astype(jnp.float32).reshape(1, D)

    grid = (n_rows, dff_p // tf)

    flops = 4 * rows_p * D * dff_p
    bytes_accessed = (rows_p * D * (2 + 4)            # x in (bf16) + out (f32)
                      + n_rows * 2 * D * dff_p * 2    # W1/W2 streamed per row tile
                      + (dff_p + D) * 4)              # biases
    vmem_limit = int(min(100 << 20,
                         max(32 << 20, int(_vmem_bytes(tm, tf, D) * 1.5))))

    out = pl.pallas_call(
        _ffn_kernel,
        out_shape=jax.ShapeDtypeStruct((rows_p, D), jnp.float32),
        grid_spec=pltpu.PrefetchScalarGridSpec(
            num_scalar_prefetch=0,
            grid=grid,
            in_specs=[
                pl.BlockSpec((tm, D), lambda i, j: (i, 0)),    # x rows
                pl.BlockSpec((D, tf), lambda i, j: (0, j)),    # W1 slice
                pl.BlockSpec((1, tf), lambda i, j: (0, j)),    # b1 slice
                pl.BlockSpec((tf, D), lambda i, j: (j, 0)),    # W2 slice
                pl.BlockSpec((1, D), lambda i, j: (0, 0)),     # b2
            ],
            out_specs=pl.BlockSpec((tm, D), lambda i, j: (i, 0)),
        ),
        compiler_params=pltpu.CompilerParams(
            dimension_semantics=("parallel", "arbitrary"),
            vmem_limit_bytes=vmem_limit),
        cost_estimate=pl.CostEstimate(flops=flops,
                                      bytes_accessed=bytes_accessed,
                                      transcendentals=0),
    )(x2, w1, b1_2, w2, b2_2)

    out = out[:rows].astype(orig_dtype)
    return out.reshape(B, S, D)


if __name__ == "__main__":
    key = jax.random.PRNGKey(0)
    # Small but lane-aligned shapes: batch=2, context=8, d_model=128, d_ff=256.
    B, S, D, Dff = 2, 8, 128, 256

    kx, k1, k2, k3, k4 = jax.random.split(key, 5)
    x = jax.random.normal(kx, (B, S, D), dtype=jnp.float32)
    w1 = jax.random.normal(k1, (D, Dff), dtype=jnp.float32) / jnp.sqrt(D)
    b1 = 0.1 * jax.random.normal(k2, (Dff,), dtype=jnp.float32)
    w2 = jax.random.normal(k3, (Dff, D), dtype=jnp.float32) / jnp.sqrt(Dff)
    b2 = 0.1 * jax.random.normal(k4, (D,), dtype=jnp.float32)

    out = feed_forward(x, w1, b1, w2, b2)
    out = jax.block_until_ready(out)

    # References: (a) same bf16-operand / f32-accumulation recipe as the kernel,
    # (b) full f32 HIGHEST precision (looser tolerance due to bf16 rounding).
    x2 = x.reshape(-1, D)
    hb = jnp.maximum(
        jnp.dot(x2.astype(jnp.bfloat16), w1.astype(jnp.bfloat16),
                preferred_element_type=jnp.float32) + b1, 0.0)
    ref_bf16 = (jnp.dot(hb.astype(jnp.bfloat16), w2.astype(jnp.bfloat16),
                        preferred_element_type=jnp.float32) + b2).reshape(B, S, D)
    hf = jnp.maximum(
        jnp.dot(x2, w1, precision=jax.lax.Precision.HIGHEST) + b1, 0.0)
    ref_f32 = (jnp.dot(hf, w2, precision=jax.lax.Precision.HIGHEST) + b2
               ).reshape(B, S, D)

    assert out.shape == (B, S, D)
    assert jnp.allclose(out, ref_bf16, atol=1e-2, rtol=1e-2), "mismatch vs bf16 ref"
    assert jnp.allclose(out, ref_f32, atol=6e-2, rtol=6e-2), "mismatch vs f32 ref"

    print("KERNEL_OK")
</pallas_src>

<mosaic_0001>
module attributes {stable_mosaic.version = 11 : i64} {
  func.func @_ffn_kernel(%arg0: i32, %arg1: i32, %arg2: memref<8x128xbf16, #tpu.memory_space<vmem>>, %arg3: memref<128x256xbf16, #tpu.memory_space<vmem>>, %arg4: memref<1x256xf32, #tpu.memory_space<vmem>>, %arg5: memref<256x128xbf16, #tpu.memory_space<vmem>>, %arg6: memref<1x128xf32, #tpu.memory_space<vmem>>, %arg7: memref<8x128xf32, #tpu.memory_space<vmem>>) attributes {dimension_semantics = [#tpu.dimension_semantics<parallel>, #tpu.dimension_semantics<arbitrary>], iteration_bounds = array<i64: 2, 1>, scalar_prefetch = 0 : i64, scratch_operands = 0 : i64, tpu.core_type = #tpu.core_type<tc>, window_params = [{transform_indices = @transform_0, window_bounds = array<i64: 8, 128>}, {transform_indices = @transform_1, window_bounds = array<i64: 128, 256>}, {transform_indices = @transform_2, window_bounds = array<i64: 1, 256>}, {transform_indices = @transform_3, window_bounds = array<i64: 256, 128>}, {pipeline_mode = #tpu.pipeline_mode<synchronous>, transform_indices = @transform_4, window_bounds = array<i64: 1, 128>}, {transform_indices = @transform_5, window_bounds = array<i64: 8, 128>}]} {
    %c0_i32 = arith.constant 0 : i32
    %0 = arith.cmpi eq, %arg1, %c0_i32 : i32
    %1 = arith.extui %0 : i1 to i32
    %c0_i32_0 = arith.constant 0 : i32
    %2 = arith.cmpi ne, %1, %c0_i32_0 : i32
    scf.if %2 {
      %cst_16 = arith.constant 0.000000e+00 : f32
      %20 = vector.broadcast %cst_16 : f32 to vector<8x128xf32>
      %c0_17 = arith.constant 0 : index
      %c0_18 = arith.constant 0 : index
      %21 = vector.load %arg7[%c0_17, %c0_18] : memref<8x128xf32, #tpu.memory_space<vmem>>, vector<8x128xf32>
      tpu.vector_store %arg7[%c0_17, %c0_18], %20 {strides = array<i32>} : memref<8x128xf32, #tpu.memory_space<vmem>>, vector<8x128xf32>,
    } else {
    }
    %c0 = arith.constant 0 : index
    %c0_1 = arith.constant 0 : index
    %3 = vector.load %arg2[%c0, %c0_1] : memref<8x128xbf16, #tpu.memory_space<vmem>>, vector<8x128xbf16>
    %c0_2 = arith.constant 0 : index
    %c0_3 = arith.constant 0 : index
    %4 = vector.load %arg3[%c0_2, %c0_3] : memref<128x256xbf16, #tpu.memory_space<vmem>>, vector<128x256xbf16>
    %cst = arith.constant dense<0.000000e+00> : vector<8x256xf32>
    %5 = tpu.matmul %3, %4, %cst {dimension_numbers = #tpu.dot_dimension_numbers<[1], [0], [0], [1], [0, 0, 1, 1], [], []>} : vector<8x128xbf16>, vector<128x256xbf16>, vector<8x256xf32> -> vector<8x256xf32>
    %c0_4 = arith.constant 0 : index
    %c0_5 = arith.constant 0 : index
    %6 = vector.load %arg4[%c0_4, %c0_5] : memref<1x256xf32, #tpu.memory_space<vmem>>, vector<1x256xf32>
    %7 = vector.broadcast %6 : vector<1x256xf32> to vector<8x256xf32>
    %8 = arith.addf %5, %7 : vector<8x256xf32>
    %cst_6 = arith.constant 0.000000e+00 : f32
    %9 = vector.broadcast %cst_6 : f32 to vector<8x256xf32>
    %10 = arith.maximumf %8, %9 : vector<8x256xf32>
    %c0_7 = arith.constant 0 : index
    %c0_8 = arith.constant 0 : index
    %11 = vector.load %arg7[%c0_7, %c0_8] : memref<8x128xf32, #tpu.memory_space<vmem>>, vector<8x128xf32>
    %12 = arith.truncf %10 : vector<8x256xf32> to vector<8x256xbf16>
    %c0_9 = arith.constant 0 : index
    %c0_10 = arith.constant 0 : index
    %13 = vector.load %arg5[%c0_9, %c0_10] : memref<256x128xbf16, #tpu.memory_space<vmem>>, vector<256x128xbf16>
    %cst_11 = arith.constant dense<0.000000e+00> : vector<8x128xf32>
    %14 = tpu.matmul %12, %13, %cst_11 {dimension_numbers = #tpu.dot_dimension_numbers<[1], [0], [0], [1], [0, 0, 1, 1], [], []>} : vector<8x256xbf16>, vector<256x128xbf16>, vector<8x128xf32> -> vector<8x128xf32>
    %15 = arith.addf %11, %14 : vector<8x128xf32>
    %c0_12 = arith.constant 0 : index
    %c0_13 = arith.constant 0 : index
    %16 = vector.load %arg7[%c0_12, %c0_13] : memref<8x128xf32, #tpu.memory_space<vmem>>, vector<8x128xf32>
    tpu.vector_store %arg7[%c0_12, %c0_13], %15 {strides = array<i32>} : memref<8x128xf32, #tpu.memory_space<vmem>>, vector<8x128xf32>,
    %c0_i32_14 = arith.constant 0 : i32
    %17 = arith.cmpi eq, %arg1, %c0_i32_14 : i32
    %18 = arith.extui %17 : i1 to i32
    %c0_i32_15 = arith.constant 0 : i32
    %19 = arith.cmpi ne, %18, %c0_i32_15 : i32
    scf.if %19 {
      %c0_16 = arith.constant 0 : index
      %c0_17 = arith.constant 0 : index
      %20 = vector.load %arg7[%c0_16, %c0_17] : memref<8x128xf32, #tpu.memory_space<vmem>>, vector<8x128xf32>
      %c0_18 = arith.constant 0 : index
      %c0_19 = arith.constant 0 : index
      %21 = vector.load %arg6[%c0_18, %c0_19] : memref<1x128xf32, #tpu.memory_space<vmem>>, vector<1x128xf32>
      %22 = vector.broadcast %21 : vector<1x128xf32> to vector<8x128xf32>
      %23 = arith.addf %20, %22 : vector<8x128xf32>
      %c0_20 = arith.constant 0 : index
      %c0_21 = arith.constant 0 : index
      %24 = vector.load %arg7[%c0_20, %c0_21] : memref<8x128xf32, #tpu.memory_space<vmem>>, vector<8x128xf32>
      tpu.vector_store %arg7[%c0_20, %c0_21], %23 {strides = array<i32>} : memref<8x128xf32, #tpu.memory_space<vmem>>, vector<8x128xf32>,
    } else {
    }
    return
  }
  func.func @transform_0(%arg0: i32, %arg1: i32) -> (i32, i32) {
    %c0_i32 = arith.constant 0 : i32
    %c0_i32_0 = arith.constant 0 : i32
    return %arg0, %c0_i32 : i32, i32
  }
  func.func @transform_1(%arg0: i32, %arg1: i32) -> (i32, i32) {
    %c0_i32 = arith.constant 0 : i32
    %c0_i32_0 = arith.constant 0 : i32
    return %c0_i32, %arg1 : i32, i32
  }
  func.func @transform_2(%arg0: i32, %arg1: i32) -> (i32, i32) {
    %c0_i32 = arith.constant 0 : i32
    %c0_i32_0 = arith.constant 0 : i32
    return %c0_i32, %arg1 : i32, i32
  }
  func.func @transform_3(%arg0: i32, %arg1: i32) -> (i32, i32) {
    %c0_i32 = arith.constant 0 : i32
    %c0_i32_0 = arith.constant 0 : i32
    return %arg1, %c0_i32 : i32, i32
  }
  func.func @transform_4(%arg0: i32, %arg1: i32) -> (i32, i32) {
    %c0_i32 = arith.constant 0 : i32
    %c0_i32_0 = arith.constant 0 : i32
    %c0_i32_1 = arith.constant 0 : i32
    return %c0_i32, %c0_i32_0 : i32, i32
  }
  func.func @transform_5(%arg0: i32, %arg1: i32) -> (i32, i32) {
    %c0_i32 = arith.constant 0 : i32
    %c0_i32_0 = arith.constant 0 : i32
    return %arg0, %c0_i32 : i32, i32
  }
}

</mosaic_0001>

<bundles_post_ra>
// kernel: tpu_custom_call.1
= control target key start
LH: loop header
LB: loop body
LE: loop exit
PB: predicated region body
PF: predicated region fallthrough
CT: control target
= control target key end

     0   :  { %10 = vsyncpa [#allocation3], 0  ;;  %s1464_s0 = inlined_call_operand.hbm [shape: bf16[16,128], index: 0, kind: input, shape index: {}]   ;;  %s1465_s1 = inlined_call_operand.hbm [shape: bf16[128,256], index: 1, kind: input, shape index: {}]   ;;  %s1466_s2 = inlined_call_operand.vmem [shape: f32[1,256], index: 2, kind: input, shape index: {}]   ;;  %s1467_s3 = inlined_call_operand.hbm [shape: bf16[256,128], index: 3, kind: input, shape index: {}]   ;;  %s1468_s4 = inlined_call_operand.vmem [shape: f32[1,128], index: 4, kind: input, shape index: {}]   ;;  %s1469_s5 = inlined_call_operand.hbm [shape: f32[16,128], index: 5, kind: output, shape index: {}]  }
   0x1   :  { %12 = vsyncpa [#allocation3 + $0x1], 0 }
   0x2   :  { %13 = vsyncpa [#allocation6], 0 }
   0x3   :  { %14 = vsyncpa [#allocation4], 0 }
   0x4   :  { %16 = vsyncpa [#allocation4 + $0x1], 0  ;;  %s1204_s18 = smov 0   ;;  %s1206_s19 = smov 0  }
   0x5   :  { %s1208_s20 = smov 0   ;;  %s1210_s21 = smov 0  }
   0x6   :  { %s1212_s22 = smov 0   ;;  %s1214_s23 = smov 0  }
   0x7 LB: > { %s789_s24 = sadd.s32 4294967295, %s1163_s23   ;;  %s790_s25 = sadd.s32 4294967294, %s1163_s23   ;;  %s1163_s23 = sphi %s1214_s23, %s22_s23   ;;  %s1159_s22 = sphi %s1212_s22, %s1491_s22   ;;  %s1155_s21 = sphi %s1210_s21, %s1490_s21   ;;  %s1151_s20 = sphi %s1208_s20, %s1489_s20   ;;  %s1147_s19 = sphi %s1206_s19, %s1488_s19   ;;  %s1143_s18 = sphi %s1204_s18, %s1487_s18  }
   0x8   : > { %p54_p0 = scmp.ne.s32.totalorder %s1147_s19, %s1143_s18  ;;  %p1238_p1 = scmp.eq.s32.totalorder %s789_s24, 0 }
   0x9   : > { %p1242_p2 = scmp.eq.s32.totalorder %s789_s24, 1  ;;  %p183_p3 = scmp.eq.s32.totalorder %s790_s25, 1 }
   0xa   : > { %s1474_s26 = scalar_select %p1238_p1, 1, 0 }
   0xb   : > { %p1248_p4 = por %p1238_p1, %p54_p0  ;;  %p791_p5 = scmp.ge.s32.totalorder %s1163_s23, 1 }
   0xc   : > { %p1253_p6 = por %p183_p3, %p54_p0  ;;  %p190_p7 = scmp.lt.s32.totalorder %s1163_s23, 3 }
   0xd   : > { %s1476_s28 = scalar_select %p1248_p4, 1, 0 }
   0xe   : > { %s1477_s29 = scalar_select %p1253_p6, 1, 0 }
   0xf   : > { %p1258_p8 = pnand %p791_p5, %p190_p7  ;;  %s1165_s6 = smov [#allocation5]  }
  0x10   : > { %s205_s7 = sshll.u32 %s1165_s6, 4  ;;  %s1166_s9 = smov [#allocation7]   ;;  %s1262_s7 = int_to_ptr.vmem [resolvable:$true] %s205_s7 }
  0x11   : > { %p874_p9 = pneg %p1258_p8  ;;  %s229_s10 = sshll.u32 %s1166_s9, 4  ;;  %s1273_s10 = int_to_ptr.vmem [resolvable:$true] %s229_s10 }
  0x12   : > { %s991_s13 = scalar_lea.hbm %s1465_s1, 2048 }
  0x13   : > { %p1269_p11 = pnand %p874_p9, %p1238_p1  ;;  %p992_p12 = scmp.ne.s32.totalorder %s1465_s1, %s991_s13 }
  0x14   : > { %p998_p5 = scmp.lt.u32.totalorder %s991_s13, %s1465_s1 }
  0x15   : > { %p993_p13 = pneg %p1269_p11 }
  0x17   : > { %p994_p0 = pnand %p993_p13, %p992_p12 }
  0x19   : > { %p995_p3 = pneg %p994_p0 }
  0x1b   : > { %p1000_p7 = pnand %p998_p5, %p995_p3 }
  0x1d   : > { %1003 = shalt.err (!%p1000_p7)
}
  0x1e   : > { %s1004_s24 = scalar_lea.vmem %s1262_s7, 2048  ;;  %p1012_p1 = scmp.lt.s32.totalorder %s1262_s7, %s1262_s7 }
  0x1f   : > { %p1005_p9 = scmp.ne.s32.totalorder %s1262_s7, %s1004_s24  ;;  %p1013_p12 = scmp.lt.s32.totalorder %s1004_s24, %s1004_s24 }
  0x21   : > { %p1007_p10 = pnand %p1005_p9, %p993_p13  ;;  %p1014_p0 = por %p1013_p12, %p1012_p1 }
  0x23   : > { %p1008_p6 = pneg %p1007_p10 }
  0x25   : > { %p1015_p4 = pnand %p1014_p0, %p1008_p6 }
  0x27   : > { %1018 = shalt.err (!%p1015_p4)
}
  0x28   : > { %s1167_s25 = smov 128   ;;  %s1168_s6 = smov 8  }
  0x29   : > { %877 = dma.hbm_to_vmem [thread:$0]  (!%p1269_p11), %s1465_s1, 2048, %s1262_s7, [#allocation6], %s1167_s25, %s1167_s25, %s1168_s6  }
  0x2a   : > { %s1019_s14 = scalar_lea.hbm %s1467_s3, 2048 }
  0x2b   : > { %p1020_p1 = scmp.ne.s32.totalorder %s1467_s3, %s1019_s14  ;;  %p1026_p10 = scmp.lt.u32.totalorder %s1019_s14, %s1467_s3 }
  0x2d   : > { %p1022_p4 = pnand %p1020_p1, %p993_p13 }
  0x2f   : > { %p1023_p6 = pneg %p1022_p4 }
  0x31   : > { %p1028_p3 = pnand %p1026_p10, %p1023_p6 }
  0x33   : > { %1031 = shalt.err (!%p1028_p3)
}
  0x34   : > { %s1032_s7 = scalar_lea.vmem %s1273_s10, 2048  ;;  %p1040_p12 = scmp.lt.s32.totalorder %s1273_s10, %s1273_s10 }
  0x35   : > { %p1033_p5 = scmp.ne.s32.totalorder %s1273_s10, %s1032_s7  ;;  %p1041_p0 = scmp.lt.s32.totalorder %s1032_s7, %s1032_s7 }
  0x37   : > { %p1035_p7 = pnand %p1033_p5, %p993_p13  ;;  %p1042_p1 = por %p1041_p0, %p1040_p12 }
  0x39   : > { %p1036_p9 = pneg %p1035_p7 }
  0x3b   : > { %p1043_p4 = pnand %p1042_p1, %p1036_p9 }
  0x3d   : > { %1046 = shalt.err (!%p1043_p4)
}
  0x3e   : > { %s1169_s25 = smov 64   ;;  %s1170_s6 = smov 4  }
  0x3f   : > { %880 = dma.hbm_to_vmem [thread:$0]  (!%p1269_p11), %s1467_s3, 2048, %s1273_s10, [#allocation6], %s1169_s25, %s1169_s25, %s1170_s6  }
  0x40   : > { %s34_s12 = sadd.s32 1, %s1159_s22  ;;  %s41_s13 = sadd.s32 1, %s1151_s20 }
  0x41   : > { %p36_p13 = scmp.ge.s32.totalorder %s34_s12, 2  ;;  %p48_p6 = scmp.ne.s32.totalorder %s1151_s20, %s1147_s19 }
  0x42   : > { %p49_p10 = scmp.eq.s32.totalorder %s1163_s23, 0  ;;  %p891_p3 = scmp.lt.s32.totalorder %s1163_s23, 2 }
  0x43   : > { %s1493_s12 = smov (%p36_p13, %s34_s12), 0  ;;  %p1337_p7 = por %p1242_p2, %p48_p6 }
  0x44   : > { %p50_p5 = por %p49_p10, %p48_p6  ;;  %s38_s8 = ssub.s32 %s1159_s22, %s1493_s12 }
  0x45   : > { %s1480_s14 = scalar_select %p1337_p7, 1, 0 }
  0x46   : > { %s246_s15 = sand.u32 1, %s1151_s20   ;;  %p39_p9 = scmp.eq.s32.totalorder %s38_s8, 0 }
  0x47   : > { %s796_s10 = sshll.u32 %s246_s15, 2  ;;  %s797_s16 = sshll.u32 %s1159_s22, 6 }
  0x48   : > { %s1346_s17 = scalar_select %p39_p9, %s1151_s20, %s41_s13  }
  0x49   : > { %s1351_s25 = scalar_lea.hbm %s1464_s0, %s797_s16  ;;  %s250_s27 = scalar_lea.vmem [#allocation2], %s796_s10 }
  0x4a   : > { %s257_s6 = sshll.u32 %s250_s27, 4  ;;  %p1355_p2 = pnand %p891_p3, %p50_p5  ;;  %s1359_s6 = int_to_ptr.vmem [resolvable:$true] %s257_s6 }
  0x4b   : > { %s247_s11 = scalar_lea.sflag [#allocation3], %s246_s15  ;;  %s1047_s13 = scalar_lea.hbm %s1351_s25, 64 }
  0x4c   : > { %p1048_p11 = scmp.ne.s32.totalorder %s1351_s25, %s1047_s13  ;;  %p1049_p12 = pneg %p1355_p2 }
  0x4d   : > { %s1052_s16 = scalar_lea.hbm %s1464_s0, 128  ;;  %p1053_p4 = scmp.lt.u32.totalorder %s1351_s25, %s1464_s0 }
  0x4e   : > { %p1050_p0 = pnand %p1049_p12, %p1048_p11  ;;  %p1054_p13 = scmp.lt.u32.totalorder %s1052_s16, %s1047_s13 }
  0x4f   : > { %p1056_p10 = scmp.lt.u32.totalorder %s1047_s13, %s1351_s25 }
  0x50   : > { %p1051_p1 = pneg %p1050_p0  ;;  %p1055_p6 = por %p1054_p13, %p1053_p4 }
  0x52   : > { %p1057_p3 = por %p1056_p10, %p1055_p6 }
  0x54   : > { %p1058_p5 = pnand %p1057_p3, %p1051_p1 }
  0x56   : > { %1061 = shalt.err (!%p1058_p5)
}
  0x57   : > { %s1062_s15 = scalar_lea.vmem %s1359_s6, 64  ;;  %s1171_s27 = smov [#allocation2]  }
  0x58   : > { %p1063_p9 = scmp.ne.s32.totalorder %s1359_s6, %s1062_s15  ;;  %s1067_s8 = sshll.u32 %s1171_s27, 4  ;;  %s1068_s8 = int_to_ptr.vmem [resolvable:$false] %s1067_s8 }
  0x59   : > { %s1069_s10 = scalar_lea.vmem %s1068_s8, 128  ;;  %p1070_p7 = scmp.lt.s32.totalorder %s1359_s6, %s1068_s8 }
  0x5a   : > { %p1065_p11 = pnand %p1063_p9, %p1049_p12  ;;  %p1071_p4 = scmp.lt.s32.totalorder %s1069_s10, %s1062_s15 }
  0x5c   : > { %p1066_p0 = pneg %p1065_p11  ;;  %p1072_p13 = por %p1071_p4, %p1070_p7 }
  0x5e   : > { %p1073_p6 = pnand %p1072_p13, %p1066_p0 }
  0x60   : > { %1076 = shalt.err (!%p1073_p6)
}
  0x61   : > { %884 = dma.hbm_to_vmem [thread:$0]  (!%p1355_p2), %s1351_s25, 64, %s1359_s6, %s247_s11  }
  0x62   : > { %266 = sbr.rel (%p1258_p8) target bundleno = 593 (0x251), region = 40  ;;  %s1389_s13 = sand.u32 (!%p1258_p8), 1, %s1147_s19  }
  0x63   : > { %s799_s16 = sshll.u32 (!%p1258_p8), %s1389_s13, 2  ;;  %s269_s24 = scalar_lea.sflag (!%p1258_p8), [#allocation3], %s1389_s13 }
  0x64   : > { %s1393_s7 = scalar_lea.vmem (!%p1258_p8), [#allocation2], %s799_s16  ;;  %p1482_p7 = scmp.ne.s32.totalorder (!%p1258_p8), %s1476_s28, 0 }
  0x69   : > { %1130 = dma.done.wait (%p1482_p7), %s269_s24, 64  }
  0x6a   : > { %1132 = vsyncadd (%p1482_p7), %s269_s24, 4294967232  ;;  %p1483_p2 = scmp.ne.s32.totalorder %s1474_s26, 0 }
  0x6c   : > { %1134 = dma.done.wait (%p1483_p2), [#allocation6], 4096  }
  0x6d   : > { %1136 = vsyncadd (%p1483_p2), [#allocation6], 4294963200  ;;  %v1172_v0 = vmov 0   ;;  %v951_v1 = vld [vmem:[#allocation5 + $0x4] ss:$8 sps:$4 sm:$0xff]   ;;  %v979_v15 = vld [vmem:[#allocation7 + $0x50] sm:$0xff]   ;;  %v343_v34 = vlaneseq }
  0x6e   : > { %465 = vmatprep.mubr.bf16.mxu0 %v1172_v0  ;;  %v953_v2 = vld [vmem:[#allocation5] ss:$8 sps:$4 sm:$0xff]   ;;  %433 = vmatprep.subr.bf16.mxu0 %v951_v1  ;;  %v954_v3 = vld [vmem:[#allocation5 + $0x14] ss:$8 sps:$4 sm:$0xff]   ;;  %v956_v4 = vld [vmem:[#allocation5 + $0x10] ss:$8 sps:$4 sm:$0xff]  }
  0x6f   : > { %434 = vmatpush1.bf16.msra.mxu0 %v953_v2  ;;  %v957_v5 = vld [vmem:[#allocation5 + $0x24] ss:$8 sps:$4 sm:$0xff]   ;;  %v959_v6 = vld [vmem:[#allocation5 + $0x20] ss:$8 sps:$4 sm:$0xff]   ;;  %v960_v7 = vld [vmem:[#allocation5 + $0x34] ss:$8 sps:$4 sm:$0xff]  }
  0x70   : > { %435 = vmatprep.subr.bf16.mxu0 %v954_v3  ;;  %v962_v8 = vld [vmem:[#allocation5 + $0x30] ss:$8 sps:$4 sm:$0xff]   ;;  %v963_v9 = vld [vmem:[#allocation5 + $0x44] ss:$8 sps:$4 sm:$0xff]   ;;  %v965_v12 = vld [vmem:[#allocation5 + $0x40] ss:$8 sps:$4 sm:$0xff]  }
  0x71   : > { %v975_v10 = vld [vmem:[#allocation7 + $0x40] sm:$0xff]   ;;  %v977_v13 = vld [vmem:[#allocation7 + $0x48] sm:$0xff]   ;;  %v966_v16 = vld [vmem:[#allocation5 + $0x54] ss:$8 sps:$4 sm:$0xff]   ;;  %v344_v35 = vshrl.u32 %v343_v34, 7  ;;  %s802_s30 = sshll.u32 %s1389_s13, 3 }
  0x72   : > { %v976_v11 = vld [vmem:[#allocation7] sm:$0xff]   ;;  %840 = vmatprep.subr.bf16.mxu1 %v975_v10  ;;  %v978_v14 = vld [vmem:[#allocation7 + $0x8] sm:$0xff]   ;;  %v968_v17 = vld [vmem:[#allocation5 + $0x50] ss:$8 sps:$4 sm:$0xff]   ;;  %s837_s9 = sshll.u32 %s1155_s21, 7  ;;  %s310_s11 = scalar_lea.vmem [#allocation8], %s802_s30 }
  0x73   : > { %436 = vmatpush1.bf16.msra.mxu0 %v956_v4  ;;  %841 = vmatpush3.bf16.msra.mxu1 %v976_v11  ;;  %v980_v18 = vld [vmem:[#allocation7 + $0x10] sm:$0xff]   ;;  %v981_v19 = vld [vmem:[#allocation7 + $0x58] sm:$0xff]   ;;  %v969_v20 = vld [vmem:[#allocation5 + $0x64] ss:$8 sps:$4 sm:$0xff]   ;;  %v345_v36 = vsub.s32 0, %v344_v35  ;;  %v349_v38 = vsub.s32 1, %v344_v35  ;;  %s1415_s10 = scalar_lea.hbm %s1469_s5, %s837_s9 }
  0x74   : > { %437 = vmatprep.subr.bf16.mxu0 %v957_v5  ;;  %842 = vmatprep.subr.bf16.mxu1 %v977_v13  ;;  %v971_v21 = vld [vmem:[#allocation5 + $0x60] ss:$8 sps:$4 sm:$0xff]   ;;  %v972_v22 = vld [vmem:[#allocation5 + $0x74] ss:$8 sps:$4 sm:$0xff]   ;;  %v974_v26 = vld [vmem:[#allocation5 + $0x70] ss:$8 sps:$4 sm:$0xff]  }
  0x75   : > { %v982_v23 = vld [vmem:[#allocation7 + $0x18] sm:$0xff]   ;;  %v983_v24 = vld [vmem:[#allocation7 + $0x60] sm:$0xff]   ;;  %v985_v27 = vld [vmem:[#allocation7 + $0x68] sm:$0xff]   ;;  %s676_s15 = sshll.u32 %s310_s11, 4  ;;  %s663_s16 = scalar_lea.sflag [#allocation4], %s1389_s13  ;;  %s1417_s15 = int_to_ptr.vmem [resolvable:$true] %s676_s15 }
  0x76   : > { %v984_v25 = vld [vmem:[#allocation7 + $0x20] sm:$0xff]   ;;  %v986_v28 = vld [vmem:[#allocation7 + $0x28] sm:$0xff]   ;;  %v324_v29 = vld [vmem:[%s1393_s7] sm:$0xf]  ;;  %s1077_s24 = scalar_lea.vmem %s1417_s15, 128  ;;  %p1484_p12 = scmp.ne.s32.totalorder %s1480_s14, 0 }
  0x77   : > { %438 = vmatpush1.bf16.msra.mxu0 %v959_v6  ;;  %843 = vmatpush3.bf16.msra.mxu1 %v978_v14  ;;  %v987_v30 = vld [vmem:[#allocation7 + $0x70] sm:$0xff]   ;;  %v989_v32 = vld [vmem:[#allocation7 + $0x78] sm:$0xff]   ;;  %p1078_p8 = scmp.ne.s32.totalorder %s1417_s15, %s1077_s24  ;;  %s1173_s21 = smov [#allocation8]  }
  0x78   : > { %439 = vmatprep.subr.bf16.mxu0 %v960_v7  ;;  %844 = vmatprep.subr.bf16.mxu1 %v979_v15  ;;  %v988_v31 = vld [vmem:[#allocation7 + $0x30] sm:$0xff]   ;;  %v990_v33 = vld [vmem:[#allocation7 + $0x38] sm:$0xff]   ;;  %s1081_s7 = sshll.u32 %s1173_s21, 4  ;;  %s1082_s7 = int_to_ptr.vmem [resolvable:$false] %s1081_s7 }
  0x79   : > { %v341_v37 = vld [vmem:[%s1466_s2] sm:$0x3]  ;;  %p1079_p1 = pnand %p1078_p8, %p1484_p12  ;;  %s1083_s26 = scalar_lea.vmem %s1082_s7, 256 }
  0x7a   : > { %v346_v39 = vrot.slane %v341_v37, %v345_v36  ;;  %v350_v40 = vrot.slane %v341_v37, %v349_v38  ;;  %v835_v56 = vld [vmem:[%s1468_s4] ss:$0 sm:$0xff]  ;;  %p1084_p3 = scmp.lt.s32.totalorder %s1417_s15, %s1082_s7  ;;  %p1085_p5 = scmp.lt.s32.totalorder %s1083_s26, %s1077_s24 }
  0x7b   : > { %440 = vmatpush1.bf16.msra.mxu0 %v962_v8  ;;  %845 = vmatpush3.bf16.msra.mxu1 %v980_v18  ;;  %p1080_p10 = pneg %p1079_p1 }
  0x7c   : > { %441 = vmatprep.subr.bf16.mxu0 %v963_v9  ;;  %846 = vmatprep.subr.bf16.mxu1 %v981_v19  ;;  %p1086_p9 = por %p1085_p5, %p1084_p3 }
  0x7e   : > { %p1087_p11 = pnand %p1086_p9, %p1080_p10 }
  0x7f   : > { %442 = vmatpush1.bf16.msra.mxu0 %v965_v12  ;;  %847 = vmatpush3.bf16.msra.mxu1 %v982_v23 }
  0x80   : > { %443 = vmatprep.subr.bf16.mxu0 %v966_v16  ;;  %848 = vmatprep.subr.bf16.mxu1 %v983_v24 }
  0x83   : > { %444 = vmatpush1.bf16.msra.mxu0 %v968_v17  ;;  %849 = vmatpush3.bf16.msra.mxu1 %v984_v25 }
  0x84   : > { %445 = vmatprep.subr.bf16.mxu0 %v969_v20  ;;  %850 = vmatprep.subr.bf16.mxu1 %v985_v27 }
  0x87   : > { %446 = vmatpush1.bf16.msra.mxu0 %v971_v21  ;;  %851 = vmatpush3.bf16.msra.mxu1 %v986_v28 }
  0x88   : > { %447 = vmatprep.subr.bf16.mxu0 %v972_v22  ;;  %852 = vmatprep.subr.bf16.mxu1 %v987_v30 }
  0x8b   : > { %448 = vmatpush1.bf16.msra.mxu0 %v974_v26  ;;  %853 = vmatpush3.bf16.msra.mxu1 %v988_v31 }
  0x8c   : > { %854 = vmatprep.subr.bf16.mxu1 %v989_v32 }
  0x8e   : > { %466 = vmatmul.mubr.bf16.vlgmr.msra.gmra.mrb[0].mxu0 %v324_v29 }
  0x8f   : > { %855 = vmatpush3.bf16.msra.mxu1 %v990_v33 }
 0x161   : > { %v467_v41 = vpop.f32.mrb[0].mxu0 }
 0x162   : > { %v468_v42 = vadd.f32 %v467_v41, %v346_v39  ;;  %v469_v43 = vpop.f32.mrb[1].mxu0 }
 0x163   : > { %v470_v44 = vadd.f32 %v469_v43, %v350_v40  ;;  %v471_v45 = vpop.f32.mrb[2].mxu0 }
 0x164   : > { %v474_v46 = vmax.f32 %v468_v42, 0.0  ;;  %v472_v47 = vpop.f32.mrb[3].mxu0 }
 0x165   : > { %v475_v48 = vmax.f32 %v470_v44, 0.0 }
 0x166   : > { %v477_v50 = vpack.c.bf16 %v474_v46, %v474_v46 }
 0x167   : > { %v478_v49 = vpack.c.bf16 %v475_v48, %v475_v48 }
 0x169   : > { %639 = vmatprep.mubr.bf16.mxu1 %v478_v49 }
 0x16a   : > { %640 = vmatmul.mubr.bf16.vlgmr.msra.gmra.mrb[0].mxu1 %v477_v50 }
 0x23d   : > { %v856_v51 = vpop.f32.mrb[0].mxu1 }
 0x23e   : > { %v857_v52 = vpop.f32.mrb[1].mxu1 }
 0x23f   : > { %v858_v53 = vadd.f32 %v857_v52, %v856_v51  ;;  %v859_v54 = vpop.f32.mrb[2].mxu1 }
 0x240   : > { %v860_v55 = vpop.f32.mrb[3].mxu1 }
 0x241   : > { %v660_v57 = vadd.f32 %v858_v53, %v835_v56 }
 0x243   : > { %661 = vst [vmem:[%s310_s11] sm:$0xff] %v660_v57 }
 0x244   : > { %1090 = shalt.err (!%p1087_p11)
}
 0x245   : > { %s1091_s13 = scalar_lea.hbm %s1415_s10, 128  ;;  %s1095_s25 = scalar_lea.hbm %s1469_s5, 256 }
 0x246   : > { %p1092_p0 = scmp.ne.s32.totalorder %s1415_s10, %s1091_s13  ;;  %p1096_p6 = scmp.lt.u32.totalorder %s1415_s10, %s1469_s5 }
 0x247   : > { %p1097_p7 = scmp.lt.u32.totalorder %s1095_s25, %s1091_s13  ;;  %p1099_p8 = scmp.lt.u32.totalorder %s1091_s13, %s1415_s10 }
 0x248   : > { %p1093_p4 = pnand %p1092_p0, %p1484_p12 }
 0x249   : > { %p1098_p2 = por %p1097_p7, %p1096_p6 }
 0x24a   : > { %p1094_p13 = pneg %p1093_p4 }
 0x24b   : > { %p1100_p1 = por %p1099_p8, %p1098_p2 }
 0x24d   : > { %p1101_p10 = pnand %p1100_p1, %p1094_p13 }
 0x24f   : > { %1104 = shalt.err (!%p1101_p10)
}
 0x250   : > { %872 = dma.vmem_to_hbm [thread:$0]  (%p1484_p12), %s1417_s15, 128, %s1415_s10, %s663_s16  }
 0x251 PF: > { %s688_s11 = sand.u32 1, %s1143_s18   ;;  %p1485_p3 = scmp.ne.s32.totalorder %s1477_s29, 0 }
 0x252   : > { %p1486_p5 = scmp.ge.s32.totalorder %s1163_s23, 2  ;;  %s689_s27 = scalar_lea.sflag [#allocation4], %s688_s11 }
 0x254   : > { %p886_p9 = pnand %p1486_p5, %p1485_p3 }
 0x256   : > { %1138 = dma.done.wait (!%p886_p9), %s689_s27, 128  }
 0x257   : > { %1140 = vsyncadd (!%p886_p9), %s689_s27, 4294967168  ;;  %s22_s23 = sadd.s32 1, %s1163_s23   ;;  %s1487_s18 = smov %s1147_s19 }
 0x258   : > { %p19_p11 = scmp.ge.s32.totalorder %s22_s23, 4   ;;  %s1488_s19 = smov %s1151_s20 }
 0x259   : > { %s1489_s20 = smov %s1346_s17  ;;  %s1490_s21 = smov %s1159_s22 }
 0x25a   : > { %s1491_s22 = smov %s1493_s12  ;;  %21 = sbr.rel (!%p19_p11) target bundleno = 7 (0x7), region = 106 }
 0x261   :  { %694 = vsyncpa [#allocation3], 1 }
 0x262   :  { %696 = vsyncpa [#allocation3 + $0x1], 1 }
 0x263   :  { %697 = vsyncpa [#allocation6], 1 }
 0x264   :  { %698 = vsyncpa [#allocation4], 1 }
 0x265   :  { %700 = vsyncpa [#allocation4 + $0x1], 1 }

</bundles_post_ra>
